<compile_context>
chip_gen: v6e
topology: v6e:2x2x1
jax: 0.10.0
libtpu: 0.0.40
codegen_flags: <defaults>
</compile_context>

<pallas_src>
import jax
import jax.numpy as jnp
from jax.experimental import pallas as pl
from jax.experimental.pallas import tpu as pltpu


def _round_up(x: int, m: int) -> int:
    return ((x + m - 1) // m) * m


def _chomp_copy_kernel(x_ref, o_ref):
    # x_ref: (TR, L_in_blk) VMEM block; o_ref: (TR, L_out) VMEM block.
    l_out = o_ref.shape[-1]
    if x_ref.shape[-1] == l_out:
        # Perfectly aligned case: straight copy, no tail read, no slicing.
        o_ref[...] = x_ref[...]
    else:
        o_ref[...] = x_ref[:, :l_out]


def chomp1d(x: jax.Array, chomp_size: int,
            *, vmem_block_budget_bytes: int = 24 * 1024 * 1024) -> jax.Array:
    """Pallas implementation of Chomp1d: x[:, :, :-chomp_size]."""
    n, c, l = x.shape
    if chomp_size == 0:
        # PyTorch's x[:, :, :-0] is degenerate; Chomp1d(0) is an identity here.
        return x
    assert 0 < chomp_size < l, "chomp_size must be in [0, L)"
    l_out = l - chomp_size

    dtype = x.dtype
    itemsize = jnp.dtype(dtype).itemsize
    # Sublane multiple per dtype: f32 -> 8, bf16 -> 16, int8/fp8 -> 32.
    sub = max(8, 32 // itemsize)

    # Collapse (N, C) -> rows.
    r = n * c
    x2 = x.reshape(r, l)

    # Input block lane width: smallest 128-multiple covering l_out (skips most
    # or all of the chomped tail read); fall back to full L when it overshoots.
    l_in_blk = _round_up(l_out, 128)
    if l_in_blk > l:
        l_in_blk = l

    # Row tile: biggest sublane multiple keeping double-buffered in+out blocks
    # under the VMEM budget (conservative enough for v7x's 64 MiB VMEM).
    per_row_bytes = 2 * (l_in_blk + l_out) * itemsize  # x2 for double buffering
    max_tr = max(sub, (vmem_block_budget_bytes // per_row_bytes) // sub * sub)
    if r <= max_tr:
        tr = r  # full row extent -> always a legal block shape
    else:
        tr = max_tr  # multiple of `sub`; ragged last tile is masked by Pallas

    grid = (pl.cdiv(r, tr),)

    out2 = pl.pallas_call(
        _chomp_copy_kernel,
        out_shape=jax.ShapeDtypeStruct((r, l_out), dtype),
        grid_spec=pltpu.PrefetchScalarGridSpec(
            num_scalar_prefetch=0,
            grid=grid,
            in_specs=[pl.BlockSpec((tr, l_in_blk), lambda i: (i, 0))],
            out_specs=pl.BlockSpec((tr, l_out), lambda i: (i, 0)),
        ),
        compiler_params=pltpu.CompilerParams(
            dimension_semantics=("parallel",),
            vmem_limit_bytes=48 * 1024 * 1024,
        ),
    )(x2)

    return out2.reshape(n, c, l_out)


if __name__ == "__main__":
    key = jax.random.PRNGKey(0)

    # Small shape consistent with a Conv1d activation: (batch=2, channels=4, length=16).
    N, C, L = 2, 4, 16
    chomp_size = 3  # Chomp1d(chomp_size) has no learnable parameters
    x = jax.random.normal(key, (N, C, L), dtype=jnp.float32)

    out = jax.block_until_ready(chomp1d(x, chomp_size))
    ref = x[:, :, :-chomp_size]
    assert out.shape == (N, C, L - chomp_size), out.shape
    assert jnp.array_equal(out, ref), "mismatch vs reference slice (small case)"

    # Second small check exercising the lane-aligned prefix path
    # (l_out = 256 is a multiple of 128, so the chomped tail is never read).
    N2, C2, L2, chomp2 = 2, 16, 259, 3
    x_b = jax.random.normal(jax.random.PRNGKey(1), (N2, C2, L2), dtype=jnp.float32)
    out_b = jax.block_until_ready(chomp1d(x_b, chomp2))
    ref_b = x_b[:, :, :-chomp2]
    assert out_b.shape == (N2, C2, L2 - chomp2), out_b.shape
    assert jnp.array_equal(out_b, ref_b), "mismatch vs reference slice (aligned case)"

    print("KERNEL_OK")
</pallas_src>

<mosaic_0001>
module attributes {stable_mosaic.version = 11 : i64} {
  func.func @_chomp_copy_kernel(%arg0: i32, %arg1: memref<8x16xf32, #tpu.memory_space<vmem>>, %arg2: memref<8x13xf32, #tpu.memory_space<vmem>>) attributes {dimension_semantics = [#tpu.dimension_semantics<parallel>], iteration_bounds = array<i64: 1>, scalar_prefetch = 0 : i64, scratch_operands = 0 : i64, tpu.core_type = #tpu.core_type<tc>, window_params = [{transform_indices = @transform_0, window_bounds = array<i64: 8, 16>}, {transform_indices = @transform_1, window_bounds = array<i64: 8, 13>}]} {
    %c0 = arith.constant 0 : index
    %c0_0 = arith.constant 0 : index
    %0 = vector.load %arg1[%c0, %c0_0] : memref<8x16xf32, #tpu.memory_space<vmem>>, vector<8x13xf32>
    %c0_1 = arith.constant 0 : index
    %c0_2 = arith.constant 0 : index
    %1 = vector.load %arg2[%c0_1, %c0_2] : memref<8x13xf32, #tpu.memory_space<vmem>>, vector<8x13xf32>
    tpu.vector_store %arg2[%c0_1, %c0_2], %0 {strides = array<i32>} : memref<8x13xf32, #tpu.memory_space<vmem>>, vector<8x13xf32>,
    return
  }
  func.func @transform_0(%arg0: i32) -> (i32, i32) {
    %c0_i32 = arith.constant 0 : i32
    %c0_i32_0 = arith.constant 0 : i32
    return %arg0, %c0_i32 : i32, i32
  }
  func.func @transform_1(%arg0: i32) -> (i32, i32) {
    %c0_i32 = arith.constant 0 : i32
    %c0_i32_0 = arith.constant 0 : i32
    return %arg0, %c0_i32 : i32, i32
  }
}

</mosaic_0001>

<bundles_post_ra>
// kernel: tpu_custom_call.1
= control target key start
LH: loop header
LB: loop body
LE: loop exit
PB: predicated region body
PF: predicated region fallthrough
CT: control target
= control target key end

     0   :  { %6 = vsyncpa [#allocation3], 0  ;;  %s103_s0 = inlined_call_operand.hbm [shape: f32[8,16], index: 0, kind: input, shape index: {}]   ;;  %s104_s1 = inlined_call_operand.hbm [shape: f32[8,13], index: 1, kind: output, shape index: {}]  }
   0x1   :  { %7 = vsyncpa [#allocation4], 0  ;;  %s85_s6 = smov [#allocation2]  }
   0x2   :  { %s14_s7 = sshll.u32 %s85_s6, 4  ;;  %s15_s7 = int_to_ptr.vmem [resolvable:$true] %s14_s7 }
   0x3   :  { %s49_s8 = scalar_lea.vmem %s15_s7, 128  ;;  %p54_p1 = scmp.lt.s32.totalorder %s15_s7, %s15_s7 }
   0x4   :  { %p50_p0 = scmp.ne.s32.totalorder %s15_s7, %s49_s8  ;;  %p55_p2 = scmp.lt.s32.totalorder %s49_s8, %s49_s8 }
   0x6   :  { %p56_p3 = por %p55_p2, %p54_p1 }
   0x8   :  { %p57_p4 = pnand %p56_p3, %p50_p0 }
   0xa   :  { %60 = shalt.err (!%p57_p4)
}
   0xb   :  { %17 = dma.hbm_to_vmem [thread:$0]  %s103_s0, 128, %s15_s7, [#allocation3]  }
   0xc   :  { %81 = dma.done.wait [#allocation3], 128  }
   0xd   :  { %82 = vsyncadd [#allocation3], 4294967168  ;;  %s86_s11 = smov [#allocation5]   ;;  %vm22_vm0 = vcmask 105472   ;;  %v21_v0 = vld [vmem:[#allocation2] sm:$0xff] }
   0xe   :  { %s30_s12 = sshll.u32 %s86_s11, 4  ;;  %23 = vst.msk [vmem:[#allocation5] sm:$0xff] %vm22_vm0, %v21_v0  ;;  %s31_s12 = int_to_ptr.vmem [resolvable:$true] %s30_s12 }
   0xf   :  { %s61_s13 = scalar_lea.vmem %s31_s12, 128  ;;  %p66_p6 = scmp.lt.s32.totalorder %s31_s12, %s31_s12 }
  0x10   :  { %p62_p5 = scmp.ne.s32.totalorder %s31_s12, %s61_s13  ;;  %p67_p7 = scmp.lt.s32.totalorder %s61_s13, %s61_s13 }
  0x12   :  { %p68_p8 = por %p67_p7, %p66_p6 }
  0x14   :  { %p69_p9 = pnand %p68_p8, %p62_p5 }
  0x16   :  { %72 = shalt.err (!%p69_p9)
}
  0x17   :  { %33 = dma.vmem_to_hbm [thread:$0]  %s31_s12, 128, %s104_s1, [#allocation4]  }
  0x18   :  { %83 = dma.done.wait [#allocation4], 128  }
  0x19   :  { %84 = vsyncadd [#allocation4], 4294967168 }
  0x1a   :  { %37 = vsyncpa [#allocation3], 1 }
  0x1b   :  { %38 = vsyncpa [#allocation4], 1 }

</bundles_post_ra>
